<compile_context>
chip_gen: v7x
topology: tpu7x:2x2x1
jax: 0.10.0
libtpu: 0.0.40
codegen_flags: <defaults>
</compile_context>

<pallas_src>
import functools

import jax
import jax.numpy as jnp
from jax import lax
from jax.experimental import pallas as pl
from jax.experimental.pallas import tpu as pltpu


def _group_norm_kernel(x_ref, w_ref, b_ref, o_ref, *, eps, inv_count):
    # x_ref: (R, Cg, HW) -- R whole (batch, group) slabs, lane-dense last dim.
    x = x_ref[...].astype(jnp.float32)

    # One statistics pass: lane-reduce first (XLU), then the small sublane axis.
    s_l = jnp.sum(x, axis=2, keepdims=True)          # (R, Cg, 1)
    ss_l = jnp.sum(x * x, axis=2, keepdims=True)     # (R, Cg, 1)
    s = jnp.sum(s_l, axis=1, keepdims=True)          # (R, 1, 1)
    ss = jnp.sum(ss_l, axis=1, keepdims=True)        # (R, 1, 1)

    mean = s * inv_count
    var = jnp.maximum(ss * inv_count - mean * mean, 0.0)   # biased var, f32
    inv_std = lax.rsqrt(var + eps)                          # (R, 1, 1)

    # Fold per-channel affine into a single per-element scale/shift.
    w = w_ref[...].astype(jnp.float32)               # (R, Cg, 1)
    b = b_ref[...].astype(jnp.float32)               # (R, Cg, 1)
    scale = w * inv_std                              # (R, Cg, 1)
    shift = b - mean * scale                         # (R, Cg, 1)

    # Note: on v6e/v7x with bf16 activations the normalize pass could run in
    # bf16 (stats stay f32); kept in f32 here for v5e compatibility/precision.
    o_ref[...] = (x * scale + shift).astype(o_ref.dtype)


def group_norm(x, weight, bias, num_groups, eps, *, block_cap_bytes=4 * 1024 * 1024):
    """GroupNorm forward. x: (N, C, H, W); weight/bias: (C,)."""
    N, C, H, W = x.shape
    G = num_groups
    assert C % G == 0
    Cg = C // G
    HW = H * W
    NG = N * G

    # Lane-dense layout: one row per (batch, group) slab, spatial extent last.
    x3 = x.reshape(NG, Cg, HW)

    # Per-row channel params (tiny: N*C elements) so the kernel never gathers.
    w_rows = jnp.tile(weight.reshape(G, Cg), (N, 1)).reshape(NG, Cg, 1)
    b_rows = jnp.tile(bias.reshape(G, Cg), (N, 1)).reshape(NG, Cg, 1)

    # Rows (whole slabs) per grid step: largest divisor of NG whose padded
    # block fits the budget. Tiny problems collapse to a single grid step.
    itemsize = x.dtype.itemsize
    padded_slab = (-(-Cg // 8) * 8) * (-(-HW // 128) * 128) * itemsize
    rows = 1
    for r in range(1, min(NG, 128) + 1):
        if NG % r == 0 and r * padded_slab <= block_cap_bytes:
            rows = r
    num_blocks = NG // rows
    # Note: a single slab larger than the cap still goes through as one block;
    # a two-pass spatial split (sum/sumsq pass + normalize pass) would be the
    # next step to keep double-buffering alive on v7x for extreme slab sizes.

    kernel = functools.partial(
        _group_norm_kernel, eps=float(eps), inv_count=1.0 / float(Cg * HW)
    )

    out3 = pl.pallas_call(
        kernel,
        out_shape=jax.ShapeDtypeStruct((NG, Cg, HW), x.dtype),
        grid_spec=pltpu.PrefetchScalarGridSpec(
            num_scalar_prefetch=0,
            grid=(num_blocks,),
            in_specs=[
                pl.BlockSpec((rows, Cg, HW), lambda i: (i, 0, 0)),
                pl.BlockSpec((rows, Cg, 1), lambda i: (i, 0, 0)),
                pl.BlockSpec((rows, Cg, 1), lambda i: (i, 0, 0)),
            ],
            out_specs=pl.BlockSpec((rows, Cg, HW), lambda i: (i, 0, 0)),
        ),
        compiler_params=pltpu.CompilerParams(
            dimension_semantics=("parallel",),
            vmem_limit_bytes=48 * 1024 * 1024,
        ),
    )(x3, w_rows, b_rows)

    return out3.reshape(N, C, H, W)


if __name__ == "__main__":
    # Module config (deterministic, synthetic): num_groups=2, num_channels=4, eps=1e-5.
    num_groups = 2
    num_channels = 4
    eps = 1e-5

    key = jax.random.PRNGKey(0)
    kx, kw, kb = jax.random.split(key, 3)

    N, C, H, W = 2, num_channels, 16, 16
    x = jax.random.normal(kx, (N, C, H, W), dtype=jnp.float32)
    # Parameters as in __init__ (ones/zeros), perturbed deterministically so
    # the affine path is actually exercised.
    weight = jnp.ones((C,), jnp.float32) + 0.1 * jax.random.normal(kw, (C,), jnp.float32)
    bias = jnp.zeros((C,), jnp.float32) + 0.1 * jax.random.normal(kb, (C,), jnp.float32)

    out = group_norm(x, weight, bias, num_groups, eps)
    out = jax.block_until_ready(out)

    # Pure-JAX reference check (PyTorch GroupNorm semantics: biased variance).
    xr = x.reshape(N, num_groups, C // num_groups, H, W).astype(jnp.float32)
    mean = xr.mean(axis=(2, 3, 4), keepdims=True)
    var = ((xr - mean) ** 2).mean(axis=(2, 3, 4), keepdims=True)
    ref = ((xr - mean) / jnp.sqrt(var + eps)).reshape(N, C, H, W)
    ref = ref * weight[None, :, None, None] + bias[None, :, None, None]

    assert out.shape == (N, C, H, W)
    assert jnp.allclose(out, ref, atol=1e-5, rtol=1e-5), "mismatch vs reference"

    print("KERNEL_OK")
</pallas_src>

<mosaic_0001>
module attributes {stable_mosaic.version = 11 : i64} {
  func.func @_group_norm_kernel(%arg0: i32, %arg1: memref<4x2x256xf32, #tpu.memory_space<vmem>>, %arg2: memref<4x2x1xf32, #tpu.memory_space<vmem>>, %arg3: memref<4x2x1xf32, #tpu.memory_space<vmem>>, %arg4: memref<4x2x256xf32, #tpu.memory_space<vmem>>) attributes {dimension_semantics = [#tpu.dimension_semantics<parallel>], iteration_bounds = array<i64: 1>, scalar_prefetch = 0 : i64, scratch_operands = 0 : i64, tpu.core_type = #tpu.core_type<tc>, window_params = [{transform_indices = @transform_0, window_bounds = array<i64: 4, 2, 256>}, {transform_indices = @transform_1, window_bounds = array<i64: 4, 2, 1>}, {transform_indices = @transform_2, window_bounds = array<i64: 4, 2, 1>}, {transform_indices = @transform_3, window_bounds = array<i64: 4, 2, 256>}]} {
    %c0 = arith.constant 0 : index
    %c0_0 = arith.constant 0 : index
    %c0_1 = arith.constant 0 : index
    %0 = vector.load %arg1[%c0, %c0_0, %c0_1] : memref<4x2x256xf32, #tpu.memory_space<vmem>>, vector<4x2x256xf32>
    %cst = arith.constant dense<0.000000e+00> : vector<4x2xf32>
    %1 = vector.multi_reduction <add>, %0, %cst [2] : vector<4x2x256xf32> to vector<4x2xf32>
    %2 = vector.shape_cast %1 : vector<4x2xf32> to vector<4x2x1xf32>
    %3 = arith.mulf %0, %0 : vector<4x2x256xf32>
    %cst_2 = arith.constant dense<0.000000e+00> : vector<4x2xf32>
    %4 = vector.multi_reduction <add>, %3, %cst_2 [2] : vector<4x2x256xf32> to vector<4x2xf32>
    %5 = vector.shape_cast %4 : vector<4x2xf32> to vector<4x2x1xf32>
    %cst_3 = arith.constant dense<0.000000e+00> : vector<4x1xf32>
    %6 = vector.multi_reduction <add>, %2, %cst_3 [1] : vector<4x2x1xf32> to vector<4x1xf32>
    %7 = vector.shape_cast %6 : vector<4x1xf32> to vector<4x1x1xf32>
    %cst_4 = arith.constant dense<0.000000e+00> : vector<4x1xf32>
    %8 = vector.multi_reduction <add>, %5, %cst_4 [1] : vector<4x2x1xf32> to vector<4x1xf32>
    %9 = vector.shape_cast %8 : vector<4x1xf32> to vector<4x1x1xf32>
    %cst_5 = arith.constant 0.001953125 : f32
    %10 = vector.broadcast %cst_5 : f32 to vector<4x1x1xf32>
    %11 = arith.mulf %7, %10 : vector<4x1x1xf32>
    %cst_6 = arith.constant 0.001953125 : f32
    %12 = vector.broadcast %cst_6 : f32 to vector<4x1x1xf32>
    %13 = arith.mulf %9, %12 : vector<4x1x1xf32>
    %14 = arith.mulf %11, %11 : vector<4x1x1xf32>
    %15 = arith.subf %13, %14 : vector<4x1x1xf32>
    %cst_7 = arith.constant 0.000000e+00 : f32
    %16 = vector.broadcast %cst_7 : f32 to vector<4x1x1xf32>
    %17 = arith.maximumf %15, %16 : vector<4x1x1xf32>
    %cst_8 = arith.constant 9.99999974E-6 : f32
    %18 = vector.broadcast %cst_8 : f32 to vector<4x1x1xf32>
    %19 = arith.addf %17, %18 : vector<4x1x1xf32>
    %20 = math.rsqrt %19 : vector<4x1x1xf32>
    %c0_9 = arith.constant 0 : index
    %c0_10 = arith.constant 0 : index
    %c0_11 = arith.constant 0 : index
    %21 = vector.load %arg2[%c0_9, %c0_10, %c0_11] : memref<4x2x1xf32, #tpu.memory_space<vmem>>, vector<4x2x1xf32>
    %c0_12 = arith.constant 0 : index
    %c0_13 = arith.constant 0 : index
    %c0_14 = arith.constant 0 : index
    %22 = vector.load %arg3[%c0_12, %c0_13, %c0_14] : memref<4x2x1xf32, #tpu.memory_space<vmem>>, vector<4x2x1xf32>
    %23 = vector.broadcast %20 : vector<4x1x1xf32> to vector<4x2x1xf32>
    %24 = arith.mulf %21, %23 : vector<4x2x1xf32>
    %25 = vector.broadcast %11 : vector<4x1x1xf32> to vector<4x2x1xf32>
    %26 = arith.mulf %25, %24 : vector<4x2x1xf32>
    %27 = arith.subf %22, %26 : vector<4x2x1xf32>
    %28 = vector.broadcast %24 : vector<4x2x1xf32> to vector<4x2x256xf32>
    %29 = arith.mulf %0, %28 : vector<4x2x256xf32>
    %30 = vector.broadcast %27 : vector<4x2x1xf32> to vector<4x2x256xf32>
    %31 = arith.addf %29, %30 : vector<4x2x256xf32>
    %c0_15 = arith.constant 0 : index
    %c0_16 = arith.constant 0 : index
    %c0_17 = arith.constant 0 : index
    %32 = vector.load %arg4[%c0_15, %c0_16, %c0_17] : memref<4x2x256xf32, #tpu.memory_space<vmem>>, vector<4x2x256xf32>
    tpu.vector_store %arg4[%c0_15, %c0_16, %c0_17], %31 {strides = array<i32>} : memref<4x2x256xf32, #tpu.memory_space<vmem>>, vector<4x2x256xf32>,
    return
  }
  func.func @transform_0(%arg0: i32) -> (i32, i32, i32) {
    %c0_i32 = arith.constant 0 : i32
    %c0_i32_0 = arith.constant 0 : i32
    %c0_i32_1 = arith.constant 0 : i32
    return %arg0, %c0_i32, %c0_i32_0 : i32, i32, i32
  }
  func.func @transform_1(%arg0: i32) -> (i32, i32, i32) {
    %c0_i32 = arith.constant 0 : i32
    %c0_i32_0 = arith.constant 0 : i32
    %c0_i32_1 = arith.constant 0 : i32
    return %arg0, %c0_i32, %c0_i32_0 : i32, i32, i32
  }
  func.func @transform_2(%arg0: i32) -> (i32, i32, i32) {
    %c0_i32 = arith.constant 0 : i32
    %c0_i32_0 = arith.constant 0 : i32
    %c0_i32_1 = arith.constant 0 : i32
    return %arg0, %c0_i32, %c0_i32_0 : i32, i32, i32
  }
  func.func @transform_3(%arg0: i32) -> (i32, i32, i32) {
    %c0_i32 = arith.constant 0 : i32
    %c0_i32_0 = arith.constant 0 : i32
    %c0_i32_1 = arith.constant 0 : i32
    return %arg0, %c0_i32, %c0_i32_0 : i32, i32, i32
  }
}

</mosaic_0001>

<bundles_post_ra>
// kernel: tpu_custom_call.1
= control target key start
LH: loop header
LB: loop body
LE: loop exit
PB: predicated region body
PF: predicated region fallthrough
CT: control target
= control target key end

     0   :  { %v26_v0 = vlaneseq  ;;  %v420_v1 = vmov 1983009808   ;;  %s546_s0 = inlined_call_operand.vmem [shape: f32[4,2,256], index: 0, kind: input, shape index: {}]   ;;  %s547_s1 = inlined_call_operand.vmem [shape: f32[4,2,1], index: 1, kind: input, shape index: {}]   ;;  %s548_s2 = inlined_call_operand.vmem [shape: f32[4,2,1], index: 2, kind: input, shape index: {}]   ;;  %s549_s3 = inlined_call_operand.hbm [shape: f32[4,2,256], index: 3, kind: output, shape index: {}]  }
   0x1   :  { %v24_v2 = vunpack.c.l.s4 %v420_v1 }
   0x2   :  { %v446_v3 = vshrl.u32 %v26_v0, 7 }
   0x3   :  { %8 = vsyncpa [#allocation3], 0  ;;  %v25_v4 = vunpack.c.0.s8 %v24_v2  ;;  %v451_v5 = vld [vmem:[%s546_s0] sm:$0xf]  ;;  %v456_v6 = vld [vmem:[%s546_s0 + $0xc] sm:$0xf] }
   0x4   :  { %v461_v7 = vld [vmem:[%s546_s0 + $0x4] sm:$0xf]  ;;  %v466_v8 = vld [vmem:[%s546_s0 + $0x8] sm:$0xf]  ;;  %v84_v10 = vmul.f32 %v451_v5, %v451_v5  ;;  %v87_v11 = vmul.f32 %v456_v6, %v456_v6  ;;  %vm63_vm0 = vcmask 1041408   ;;  %v421_v54 = vmov 0  }
   0x5   :  { %v85_v9 = vmul.f32 %v461_v7, %v461_v7  ;;  %v28_v12 = vsub.s32 %v25_v4, %v446_v3  ;;  %v86_v13 = vmul.f32 %v466_v8, %v466_v8  ;;  %387 = vset.pattern.permute.xlu1 %v421_v54  ;;  %386 = vset.pattern.permute.xlu0 %v421_v54 }
   0x7   :  { %v45_v14 = vrot.slane %v466_v8, %v28_v12  ;;  %v29_v15 = vrot.slane %v451_v5, %v28_v12  ;;  %v53_v16 = vrot.slane %v456_v6, %v28_v12  ;;  %v37_v17 = vrot.slane %v461_v7, %v28_v12 }
   0x8   :  { %v106_v18 = vrot.slane %v85_v9, %v28_v12  ;;  %v98_v19 = vrot.slane %v84_v10, %v28_v12  ;;  %v122_v20 = vrot.slane %v87_v11, %v28_v12  ;;  %v114_v28 = vrot.slane %v86_v13, %v28_v12 }
   0x9   :  { %v46_v21 = vcombine.high %v45_v14, %v45_v14  ;;  %v74_v22 = vsel %vm63_vm0, %v45_v14, 0.0  ;;  %v30_v23 = vcombine.high %v29_v15, %v29_v15  ;;  %v64_v24 = vsel %vm63_vm0, %v29_v15, 0.0 }
   0xa   :  { %v54_v25 = vcombine.high %v53_v16, %v53_v16  ;;  %v79_v26 = vsel %vm63_vm0, %v53_v16, 0.0  ;;  %v38_v27 = vcombine.high %v37_v17, %v37_v17  ;;  %v69_v31 = vsel %vm63_vm0, %v37_v17, 0.0 }
   0xb   :  { %v75_v29 = vsel %vm63_vm0, %v46_v21, 0.0  ;;  %v65_v30 = vsel %vm63_vm0, %v30_v23, 0.0  ;;  %v107_v32 = vcombine.high %v106_v18, %v106_v18  ;;  %v99_v37 = vcombine.high %v98_v19, %v98_v19 }
   0xc   :  { %v76_v33 = vadd.f32 %v75_v29, %v74_v22  ;;  %v66_v34 = vadd.f32 %v65_v30, %v64_v24  ;;  %v80_v35 = vsel %vm63_vm0, %v54_v25, 0.0  ;;  %v70_v36 = vsel %vm63_vm0, %v38_v27, 0.0 }
   0xd   :  { %v81_v38 = vadd.f32 %v80_v35, %v79_v26  ;;  %v71_v39 = vadd.f32 %v70_v36, %v69_v31  ;;  %v137_v40 = vsel %vm63_vm0, %v106_v18, 0.0  ;;  %v138_v41 = vsel %vm63_vm0, %v107_v32, 0.0 }
   0xe   :  { %77 = vadd.xlane.f32.xlu1 %v76_v33  ;;  %67 = vadd.xlane.f32.xlu0 %v66_v34  ;;  %v132_v42 = vsel %vm63_vm0, %v98_v19, 0.0  ;;  %v133_v43 = vsel %vm63_vm0, %v99_v37, 0.0  ;;  %v123_v44 = vcombine.high %v122_v20, %v122_v20  ;;  %v115_v45 = vcombine.high %v114_v28, %v114_v28 }
   0xf   :  { %v139_v46 = vadd.f32 %v138_v41, %v137_v40  ;;  %v134_v47 = vadd.f32 %v133_v43, %v132_v42  ;;  %v147_v48 = vsel %vm63_vm0, %v122_v20, 0.0  ;;  %v142_v50 = vsel %vm63_vm0, %v114_v28, 0.0 }
  0x10   :  { %v148_v49 = vsel %vm63_vm0, %v123_v44, 0.0  ;;  %v143_v51 = vsel %vm63_vm0, %v115_v45, 0.0 }
  0x11   :  { %v149_v52 = vadd.f32 %v148_v49, %v147_v48  ;;  %v144_v53 = vadd.f32 %v143_v51, %v142_v50 }
  0x12   :  { %82 = vadd.xlane.f32.xlu1 %v81_v38  ;;  %72 = vadd.xlane.f32.xlu0 %v71_v39 }
  0x16   :  { %140 = vadd.xlane.f32.xlu1 %v139_v46  ;;  %135 = vadd.xlane.f32.xlu0 %v134_v47 }
  0x1a   :  { %150 = vadd.xlane.f32.xlu1 %v149_v52  ;;  %145 = vadd.xlane.f32.xlu0 %v144_v53 }
  0x9b   :  { %v78_v55 = vpop.xlane.xlu1 %77  ;;  %v68_v56 = vpop.xlane.xlu0 %67 }
  0x9c   :  { %v166_v57 = vsel %vm63_vm0, %v78_v55, 0.0  ;;  %v152_v58 = vsel %vm63_vm0, %v68_v56, 0.0 }
  0x9d   :  { %v167_v59 = vrot.slane %v166_v57, 4  ;;  %v153_v60 = vrot.slane %v152_v58, 4 }
  0x9f   :  { %v168_v61 = vadd.f32 %v167_v59, %v166_v57  ;;  %v154_v62 = vadd.f32 %v153_v60, %v152_v58  ;;  %v83_v63 = vpop.xlane.xlu1 %82  ;;  %v73_v0 = vpop.xlane.xlu0 %72 }
  0xa0   :  { %v173_v1 = vsel %vm63_vm0, %v83_v63, 0.0  ;;  %v159_v2 = vsel %vm63_vm0, %v73_v0, 0.0 }
  0xa1   :  { %v169_v4 = vrot.slane %v168_v61, 2  ;;  %v155_v9 = vrot.slane %v154_v62, 2  ;;  %v174_v10 = vrot.slane %v173_v1, 4  ;;  %v160_v11 = vrot.slane %v159_v2, 4 }
  0xa3   :  { %v156_v12 = vadd.f32 %v155_v9, %v154_v62  ;;  %v175_v13 = vadd.f32 %v174_v10, %v173_v1  ;;  %v161_v14 = vadd.f32 %v160_v11, %v159_v2  ;;  %v141_v15 = vpop.xlane.xlu1 %140  ;;  %v136_v16 = vpop.xlane.xlu0 %135  ;;  %v170_v19 = vadd.f32 %v169_v4, %v168_v61 }
  0xa4   :  { %v187_v17 = vsel %vm63_vm0, %v141_v15, 0.0  ;;  %v180_v18 = vsel %vm63_vm0, %v136_v16, 0.0 }
  0xa5   :  { %v157_v20 = vrot.slane %v156_v12, 1  ;;  %v176_v21 = vrot.slane %v175_v13, 2  ;;  %v162_v22 = vrot.slane %v161_v14, 2  ;;  %v188_v23 = vrot.slane %v187_v17, 4 }
  0xa6   :  { %v181_v24 = vrot.slane %v180_v18, 4  ;;  %v171_v33 = vrot.slane %v170_v19, 1 }
  0xa7   :  { %v177_v25 = vadd.f32 %v176_v21, %v175_v13  ;;  %v163_v26 = vadd.f32 %v162_v22, %v161_v14  ;;  %v151_v27 = vpop.xlane.xlu1 %150  ;;  %v146_v28 = vpop.xlane.xlu0 %145  ;;  %v189_v29 = vadd.f32 %v188_v23, %v187_v17  ;;  %v158_v34 = vadd.f32 %v157_v20, %v156_v12 }
  0xa8   :  { %v182_v30 = vadd.f32 %v181_v24, %v180_v18  ;;  %v201_v31 = vsel %vm63_vm0, %v151_v27, 0.0  ;;  %v194_v32 = vsel %vm63_vm0, %v146_v28, 0.0  ;;  %v172_v46 = vadd.f32 %v171_v33, %v170_v19 }
  0xa9   :  { %v178_v35 = vrot.slane %v177_v25, 1  ;;  %v164_v36 = vrot.slane %v163_v26, 1  ;;  %v190_v37 = vrot.slane %v189_v29, 2  ;;  %v202_v39 = vrot.slane %v201_v31, 4 }
  0xaa   :  { %v183_v38 = vrot.slane %v182_v30, 2  ;;  %v195_v40 = vrot.slane %v194_v32, 4  ;;  %v208_v47 = vmul.f32 0.001953125, %v158_v34  ;;  %v210_v58 = vmul.f32 0.001953125, %v172_v46 }
  0xab   :  { %v165_v41 = vadd.f32 %v164_v36, %v163_v26  ;;  %v191_v42 = vadd.f32 %v190_v37, %v189_v29  ;;  %v203_v44 = vadd.f32 %v202_v39, %v201_v31  ;;  %v179_v48 = vadd.f32 %v178_v35, %v177_v25  ;;  %v237_v25 = vld [vmem:[%s547_s1 + $0x2] sm:$0x3]  ;;  %v236_v26 = vld [vmem:[%s547_s1] sm:$0x3]  ;;  %v238_v31 = vld [vmem:[%s547_s1 + $0x4] sm:$0x3] }
  0xac   :  { %v184_v43 = vadd.f32 %v183_v38, %v182_v30  ;;  %v196_v45 = vadd.f32 %v195_v40, %v194_v32  ;;  %v216_v59 = vmul.f32 %v208_v47, %v208_v47  ;;  %v218_v11 = vmul.f32 %v210_v58, %v210_v58  ;;  %v239_v35 = vld [vmem:[%s547_s1 + $0x6] sm:$0x3]  ;;  %v240_v38 = vld [vmem:[%s548_s2] sm:$0x3] }
  0xad   :  { %v209_v49 = vmul.f32 0.001953125, %v165_v41  ;;  %v192_v50 = vrot.slane %v191_v42, 1  ;;  %v204_v52 = vrot.slane %v203_v44, 2  ;;  %v211_v60 = vmul.f32 0.001953125, %v179_v48  ;;  %v241_v41 = vld [vmem:[%s548_s2 + $0x2] sm:$0x3] }
  0xae   :  { %v185_v51 = vrot.slane %v184_v43, 1  ;;  %v197_v53 = vrot.slane %v196_v45, 2 }
  0xaf   :  { %v193_v54 = vadd.f32 %v192_v50, %v191_v42  ;;  %v205_v56 = vadd.f32 %v204_v52, %v203_v44  ;;  %v217_v61 = vmul.f32 %v209_v49, %v209_v49  ;;  %v219_v12 = vmul.f32 %v211_v60, %v211_v60  ;;  %v242_v44 = vld [vmem:[%s548_s2 + $0x4] sm:$0x3] }
  0xb0   :  { %v186_v55 = vadd.f32 %v185_v51, %v184_v43  ;;  %v198_v57 = vadd.f32 %v197_v53, %v196_v45 }
  0xb1   :  { %v213_v62 = vmul.f32 0.001953125, %v193_v54  ;;  %v206_v0 = vrot.slane %v205_v56, 1 }
  0xb2   :  { %v212_v63 = vmul.f32 0.001953125, %v186_v55  ;;  %v199_v1 = vrot.slane %v198_v57, 1 }
  0xb3   :  { %v221_v2 = vsub.f32 %v213_v62, %v217_v61  ;;  %v207_v9 = vadd.f32 %v206_v0, %v205_v56 }
  0xb4   :  { %v220_v4 = vsub.f32 %v212_v63, %v216_v59  ;;  %v200_v10 = vadd.f32 %v199_v1, %v198_v57 }
  0xb5   :  { %v225_v13 = vmax.f32 %v221_v2, 0.0  ;;  %v215_v15 = vmul.f32 0.001953125, %v207_v9 }
  0xb6   :  { %v224_v14 = vmax.f32 %v220_v4, 0.0  ;;  %v214_v16 = vmul.f32 0.001953125, %v200_v10 }
  0xb7   :  { %v229_v17 = vadd.f32 1e-05, %v225_v13  ;;  %v223_v19 = vsub.f32 %v215_v15, %v219_v12 }
  0xb8   :  { %v228_v18 = vadd.f32 1e-05, %v224_v14  ;;  %v222_v20 = vsub.f32 %v214_v16, %v218_v11 }
  0xb9   :  { %388 = vrsqrt.f32 %v229_v17  ;;  %v227_v21 = vmax.f32 %v223_v19, 0.0 }
  0xba   :  { %v226_v22 = vmax.f32 %v222_v20, 0.0  ;;  %390 = vrsqrt.f32 %v228_v18 }
  0xbb   :  { %v231_v24 = vadd.f32 1e-05, %v227_v21 }
  0xbc   :  { %v230_v23 = vadd.f32 1e-05, %v226_v22 }
  0xbe   :  { %392 = vrsqrt.f32 %v230_v23 }
  0xbf   :  { %394 = vrsqrt.f32 %v231_v24 }
  0xc3   :  { %v389_v27 = vpop.eup %388 }
  0xc4   :  { %v391_v28 = vpop.eup %390  ;;  %v245_v29 = vmul.f32 %v389_v27, %v237_v25 }
  0xc5   :  { %v244_v30 = vmul.f32 %v391_v28, %v236_v26 }
  0xc6   :  { %262 = vperm.xlu1 %387, %v245_v29   ;;  %v249_v40 = vmul.f32 %v245_v29, %v209_v49  ;;  %v422_v49 = vmov 269488144  }
  0xc7   :  { %258 = vperm.xlu0 %386, %v244_v30   ;;  %v248_v37 = vmul.f32 %v244_v30, %v208_v47  ;;  %v243_v47 = vld [vmem:[%s548_s2 + $0x6] sm:$0x3]  ;;  %v273_v50 = vunpack.c.l.s4 %v422_v49  ;;  %s423_s2 = smov [#allocation2]  }
  0xc8   :  { %v393_v32 = vpop.eup %392  ;;  %v253_v42 = vsub.f32 %v241_v41, %v249_v40  ;;  %s369_s7 = sshll.u32 %s423_s2, 4  ;;  %s370_s7 = int_to_ptr.vmem [resolvable:$true] %s369_s7 }
  0xc9   :  { %v246_v33 = vmul.f32 %v393_v32, %v238_v31  ;;  %v395_v34 = vpop.eup %394  ;;  %v252_v39 = vsub.f32 %v240_v38, %v248_v37  ;;  %v274_v52 = vunpack.c.0.s8 %v273_v50  ;;  %s396_s8 = scalar_lea.vmem %s370_s7, 256  ;;  %p401_p1 = scmp.lt.s32.totalorder %s370_s7, %s370_s7 }
  0xca   :  { %v247_v36 = vmul.f32 %v395_v34, %v239_v35  ;;  %p397_p0 = scmp.ne.s32.totalorder %s370_s7, %s396_s8  ;;  %p402_p2 = scmp.lt.s32.totalorder %s396_s8, %s396_s8 }
  0xcb   :  { %266 = vperm.xlu1 %387, %v246_v33   ;;  %v250_v43 = vmul.f32 %v246_v33, %v210_v58  ;;  %v277_v54 = vsub.s32 %v274_v52, %v446_v3 }
  0xcc   :  { %v251_v46 = vmul.f32 %v247_v36, %v211_v60  ;;  %p403_p3 = por %p402_p2, %p401_p1 }
  0xcd   :  { %v254_v45 = vsub.f32 %v242_v44, %v250_v43 }
  0xce   :  { %v255_v48 = vsub.f32 %v243_v47, %v251_v46  ;;  %p404_p4 = pnand %p403_p3, %p397_p0 }
  0xcf   :  { %270 = vperm.xlu1 %387, %v247_v36  }
  0xd3   :  { %310 = vperm.xlu1 %387, %v252_v39  }
  0xd7   :  { %314 = vperm.xlu1 %387, %v253_v42  }
  0xdb   :  { %318 = vperm.xlu1 %387, %v254_v45  }
  0xdf   :  { %322 = vperm.xlu1 %387, %v255_v48  }
 0x145   :  { %v263_v51 = vpop.permute.xlu1 %262 }
 0x146   :  { %v259_v55 = vpop.permute.xlu0 %258  ;;  %v285_v59 = vrot.slane %v263_v51, %v277_v54 }
 0x147   :  { %v278_v57 = vrot.slane %v259_v55, %v277_v54 }
 0x148   :  { %v305_v0 = vmul.f32 %v285_v59, %v461_v7 }
 0x149   :  { %v304_v60 = vmul.f32 %v278_v57, %v451_v5 }
 0x14a   :  { %v267_v53 = vpop.permute.xlu1 %266 }
 0x14b   :  { %v292_v1 = vrot.slane %v267_v53, %v277_v54 }
 0x14d   :  { %v306_v10 = vmul.f32 %v292_v1, %v466_v8 }
 0x14e   :  { %v271_v56 = vpop.permute.xlu1 %270 }
 0x14f   :  { %v299_v3 = vrot.slane %v271_v56, %v277_v54 }
 0x151   :  { %v307_v5 = vmul.f32 %v299_v3, %v456_v6 }
 0x152   :  { %v311_v58 = vpop.permute.xlu1 %310 }
 0x153   :  { %v330_v61 = vrot.slane %v311_v58, %v277_v54 }
 0x155   :  { %v356_v62 = vadd.f32 %v330_v61, %v304_v60 }
 0x156   :  { %v315_v63 = vpop.permute.xlu1 %314 }
 0x157   :  { %360 = vst [vmem:[#allocation2] sm:$0xf] %v356_v62  ;;  %v337_v2 = vrot.slane %v315_v63, %v277_v54 }
 0x159   :  { %v357_v4 = vadd.f32 %v337_v2, %v305_v0 }
 0x15a   :  { %v319_v9 = vpop.permute.xlu1 %318 }
 0x15b   :  { %361 = vst [vmem:[#allocation2 + $0x4] sm:$0xf] %v357_v4  ;;  %v344_v11 = vrot.slane %v319_v9, %v277_v54 }
 0x15d   :  { %v358_v12 = vadd.f32 %v344_v11, %v306_v10 }
 0x15e   :  { %v323_v13 = vpop.permute.xlu1 %322 }
 0x15f   :  { %362 = vst [vmem:[#allocation2 + $0x8] sm:$0xf] %v358_v12  ;;  %v351_v14 = vrot.slane %v323_v13, %v277_v54 }
 0x161   :  { %v359_v7 = vadd.f32 %v351_v14, %v307_v5 }
 0x163   :  { %363 = vst [vmem:[#allocation2 + $0xc] sm:$0xf] %v359_v7 }
 0x164   :  { %407 = shalt.err (!%p404_p4)
}
 0x165   :  { %s408_s11 = scalar_lea.hbm %s549_s3, 256 }
 0x166   :  { %p409_p5 = scmp.ne.s32.totalorder %s549_s3, %s408_s11  ;;  %p412_p6 = scmp.lt.u32.totalorder %s408_s11, %s549_s3 }
 0x168   :  { %p414_p7 = pnand %p412_p6, %p409_p5 }
 0x16a   :  { %417 = shalt.err (!%p414_p7)
}
 0x16b   :  { %s424_s16 = smov 64   ;;  %s425_s17 = smov 4  }
 0x16c   :  { %375 = dma.vmem_to_hbm [thread:$0]  %s370_s7, 256, %s549_s3, [#allocation3], %s424_s16, %s424_s16, %s425_s17  }
 0x16d   :  { %418 = dma.done.wait [#allocation3], 256  }
 0x16e   :  { %419 = vsyncadd [#allocation3], 4294967040 }
 0x16f   :  { %379 = vsyncpa [#allocation3], 1 }

</bundles_post_ra>
